<compile_context>
chip_gen: v5e
topology: v5e:2x2
jax: 0.10.0
libtpu: 0.0.40
codegen_flags: <defaults>
</compile_context>

<pallas_src>
import functools

import jax
import jax.numpy as jnp
from jax.experimental import pallas as pl
from jax.experimental.pallas import tpu as pltpu


def _round_up(x, m):
    return (x + m - 1) // m * m


def _patch_proj_kernel(x_ref, w_ref, b_ref, o_ref):
    # x_ref: (tm, K)       patch-flattened activation tile (compute dtype)
    # w_ref: (K, E_pad)    projection weight, resident across the grid
    # b_ref: (1, E_pad)    fp32 bias
    # o_ref: (tm, E_pad)
    acc = jnp.dot(x_ref[...], w_ref[...], preferred_element_type=jnp.float32)
    o_ref[...] = (acc + b_ref[...]).astype(o_ref.dtype)


def _resident_block_spec(block_shape, index_map):
    """Spec for a block whose index_map is constant across the grid.

    Single-buffered: the block never changes, so the default double buffering
    only wastes VMEM.  Falls back to the default spec if this JAX version's
    BlockSpec does not take `pipeline_mode`.
    """
    try:
        return pl.BlockSpec(block_shape, index_map,
                            pipeline_mode=pl.Buffered(buffer_count=1))
    except TypeError:
        return pl.BlockSpec(block_shape, index_map)


def patch_embedding_forward(x, weight, bias, patch_size, *,
                            compute_dtype=jnp.bfloat16, tile_m=1024):
    """Equivalent of PatchEmbedding.forward.

    x:      (B, C, H, W)   NCHW, like the PyTorch module
    weight: (E, C, ph, pw) Conv2d weight
    bias:   (E,)           Conv2d bias
    returns (B, num_patches, E)
    """
    B, C, H, W = x.shape
    ph, pw = patch_size
    E = weight.shape[0]
    gh, gw = H // ph, W // pw
    P = gh * gw
    K = C * ph * pw
    M = B * P

    out_dtype = x.dtype
    cdt = jnp.dtype(compute_dtype if compute_dtype is not None else x.dtype)

    # Patch extraction in Conv2d's (c, kh, kw) feature order so the matmul
    # reproduces the strided convolution exactly.  Cast to the compute dtype
    # *before* the relayout so the transpose moves half the bytes (bf16 path).
    xp = x.astype(cdt).reshape(B, C, gh, ph, gw, pw)
    xp = jnp.transpose(xp, (0, 2, 4, 1, 3, 5)).reshape(M, K)

    w_mat = weight.reshape(E, K).T.astype(cdt)        # (K, E)
    b_mat = bias.reshape(1, E).astype(jnp.float32)    # (1, E)

    # Only the tiny weight / bias get padded (lane-dense E).  The big (M, K)
    # activation matrix is streamed unpadded.
    E_pad = _round_up(E, 128)
    if E_pad != E:
        w_mat = jnp.pad(w_mat, ((0, 0), (0, E_pad - E)))
        b_mat = jnp.pad(b_mat, ((0, 0), (0, E_pad - E)))

    isz_in = cdt.itemsize
    isz_out = jnp.dtype(out_dtype).itemsize

    # Row tile: multiple of the sublane packing factor (8 for f32, 16 for
    # bf16, 32 for 1-byte types), as big as tile_m / the VMEM budget allow,
    # small enough for >= 2 grid steps (keeps both v7x TensorCores busy).
    mult = max(8, 32 // isz_in)
    tm = max(mult, min(tile_m, _round_up(M, mult)))

    def _tile_bytes(t):
        return (2 * t * K * isz_in            # double-buffered activation tiles
                + 2 * t * E_pad * isz_out     # double-buffered output tiles
                + K * E_pad * isz_in          # single-buffered resident weight
                + 2 * E_pad * 4)              # bias
    budget = 28 << 20                         # conservative even on v7x (64 MiB)
    while tm > mult and _tile_bytes(tm) > budget:
        tm = max(mult, _round_up(tm // 2, mult))
    if pl.cdiv(M, tm) < 2 and M > mult:
        tm = max(mult, _round_up(pl.cdiv(M, 2), mult))
    grid_m = pl.cdiv(M, tm)

    vmem_limit = int(min(48 << 20,
                         max(16 << 20, int(_tile_bytes(tm) * 1.5) + (2 << 20))))

    cost = pl.CostEstimate(
        flops=2 * M * K * E_pad,
        transcendentals=0,
        bytes_accessed=(M * K * isz_in + K * E_pad * isz_in
                        + M * E_pad * isz_out + E_pad * 4),
    )

    out = pl.pallas_call(
        _patch_proj_kernel,
        out_shape=jax.ShapeDtypeStruct((M, E_pad), out_dtype),
        grid_spec=pltpu.PrefetchScalarGridSpec(
            num_scalar_prefetch=0,
            grid=(grid_m,),
            in_specs=[
                pl.BlockSpec((tm, K), lambda i: (i, 0)),             # streamed rows
                _resident_block_spec((K, E_pad), lambda i: (0, 0)),  # resident weight
                _resident_block_spec((1, E_pad), lambda i: (0, 0)),  # resident bias
            ],
            out_specs=pl.BlockSpec((tm, E_pad), lambda i: (i, 0)),
        ),
        compiler_params=pltpu.CompilerParams(
            dimension_semantics=("parallel",),
            vmem_limit_bytes=vmem_limit,
        ),
        cost_estimate=cost,
    )(xp, w_mat, b_mat)

    if E_pad != E:
        out = out[:, :E]
    return out.reshape(B, P, E)


def _reference_forward(x, weight, bias, patch_size):
    """Pure-JAX reference (strided conv, full fp32 precision)."""
    y = jax.lax.conv_general_dilated(
        x, weight,
        window_strides=patch_size,
        padding="VALID",
        dimension_numbers=("NCHW", "OIHW", "NCHW"),
        precision=jax.lax.Precision.HIGHEST,
    ) + bias.reshape(1, -1, 1, 1)
    B, E, gh, gw = y.shape
    return jnp.transpose(y.reshape(B, E, gh * gw), (0, 2, 1))


if __name__ == "__main__":
    # Small shapes consistent with the module's forward.
    B, C, H, W = 2, 4, 16, 16
    patch_size = (4, 4)
    embed_dim = 32

    key = jax.random.PRNGKey(0)
    kx, kw, kb = jax.random.split(key, 3)

    x = jax.random.normal(kx, (B, C, H, W), dtype=jnp.float32)
    weight = jax.random.normal(
        kw, (embed_dim, C, patch_size[0], patch_size[1]), dtype=jnp.float32) * 0.05
    bias = jax.random.normal(kb, (embed_dim,), dtype=jnp.float32) * 0.05

    fwd_bf16 = jax.jit(functools.partial(patch_embedding_forward,
                                         patch_size=patch_size))   # default: bf16 compute
    fwd_f32 = jax.jit(functools.partial(patch_embedding_forward,
                                        patch_size=patch_size,
                                        compute_dtype=jnp.float32))

    num_patches = (H // patch_size[0]) * (W // patch_size[1])
    ref = _reference_forward(x, weight, bias, patch_size)

    # Default bf16-compute path (fp32 accumulation): loose tolerance.
    out = fwd_bf16(x, weight, bias)
    jax.block_until_ready(out)
    assert out.shape == (B, num_patches, embed_dim)
    assert jnp.allclose(out.astype(jnp.float32), ref, atol=5e-2, rtol=5e-2), \
        "bf16-compute mismatch vs conv reference"

    # fp32-compute path: tight tolerance.
    out_f32 = fwd_f32(x, weight, bias)
    jax.block_until_ready(out_f32)
    assert out_f32.shape == (B, num_patches, embed_dim)
    assert jnp.allclose(out_f32, ref, atol=1e-3, rtol=1e-3), \
        "fp32-compute mismatch vs conv reference"

    print("KERNEL_OK")
</pallas_src>

<mosaic_0001>
module attributes {stable_mosaic.version = 11 : i64} {
  func.func @_patch_proj_kernel(%arg0: i32, %arg1: memref<16x64xbf16, #tpu.memory_space<vmem>>, %arg2: memref<64x128xbf16, #tpu.memory_space<vmem>>, %arg3: memref<1x128xf32, #tpu.memory_space<vmem>>, %arg4: memref<16x128xf32, #tpu.memory_space<vmem>>) attributes {dimension_semantics = [#tpu.dimension_semantics<parallel>], iteration_bounds = array<i64: 2>, scalar_prefetch = 0 : i64, scratch_operands = 0 : i64, tpu.core_type = #tpu.core_type<tc>, window_params = [{transform_indices = @transform_0, window_bounds = array<i64: 16, 64>}, {pipeline_mode = #tpu.pipeline_mode<synchronous>, transform_indices = @transform_1, window_bounds = array<i64: 64, 128>}, {pipeline_mode = #tpu.pipeline_mode<synchronous>, transform_indices = @transform_2, window_bounds = array<i64: 1, 128>}, {transform_indices = @transform_3, window_bounds = array<i64: 16, 128>}]} {
    %c0 = arith.constant 0 : index
    %c0_0 = arith.constant 0 : index
    %0 = vector.load %arg1[%c0, %c0_0] : memref<16x64xbf16, #tpu.memory_space<vmem>>, vector<16x64xbf16>
    %c0_1 = arith.constant 0 : index
    %c0_2 = arith.constant 0 : index
    %1 = vector.load %arg2[%c0_1, %c0_2] : memref<64x128xbf16, #tpu.memory_space<vmem>>, vector<64x128xbf16>
    %cst = arith.constant dense<0.000000e+00> : vector<16x128xf32>
    %2 = tpu.matmul %0, %1, %cst {dimension_numbers = #tpu.dot_dimension_numbers<[1], [0], [0], [1], [0, 0, 1, 1], [], []>} : vector<16x64xbf16>, vector<64x128xbf16>, vector<16x128xf32> -> vector<16x128xf32>
    %c0_3 = arith.constant 0 : index
    %c0_4 = arith.constant 0 : index
    %3 = vector.load %arg3[%c0_3, %c0_4] : memref<1x128xf32, #tpu.memory_space<vmem>>, vector<1x128xf32>
    %4 = vector.broadcast %3 : vector<1x128xf32> to vector<16x128xf32>
    %5 = arith.addf %2, %4 : vector<16x128xf32>
    %c0_5 = arith.constant 0 : index
    %c0_6 = arith.constant 0 : index
    %6 = vector.load %arg4[%c0_5, %c0_6] : memref<16x128xf32, #tpu.memory_space<vmem>>, vector<16x128xf32>
    tpu.vector_store %arg4[%c0_5, %c0_6], %5 {strides = array<i32>} : memref<16x128xf32, #tpu.memory_space<vmem>>, vector<16x128xf32>,
    return
  }
  func.func @transform_0(%arg0: i32) -> (i32, i32) {
    %c0_i32 = arith.constant 0 : i32
    %c0_i32_0 = arith.constant 0 : i32
    return %arg0, %c0_i32 : i32, i32
  }
  func.func @transform_1(%arg0: i32) -> (i32, i32) {
    %c0_i32 = arith.constant 0 : i32
    %c0_i32_0 = arith.constant 0 : i32
    %c0_i32_1 = arith.constant 0 : i32
    return %c0_i32, %c0_i32_0 : i32, i32
  }
  func.func @transform_2(%arg0: i32) -> (i32, i32) {
    %c0_i32 = arith.constant 0 : i32
    %c0_i32_0 = arith.constant 0 : i32
    %c0_i32_1 = arith.constant 0 : i32
    return %c0_i32, %c0_i32_0 : i32, i32
  }
  func.func @transform_3(%arg0: i32) -> (i32, i32) {
    %c0_i32 = arith.constant 0 : i32
    %c0_i32_0 = arith.constant 0 : i32
    return %arg0, %c0_i32 : i32, i32
  }
}

</mosaic_0001>

<bundles_post_ra>
// kernel: patch_embedding_forward.1
= control target key start
LH: loop header
LB: loop body
LE: loop exit
PB: predicated region body
PF: predicated region fallthrough
CT: control target
= control target key end

     0   :  { %8 = vsyncpa [#allocation3], 0  ;;  %s580_s0 = inlined_call_operand.vmem [shape: bf16[32,64], index: 0, kind: input, shape index: {}]   ;;  %s581_s1 = inlined_call_operand.vmem [shape: bf16[64,128], index: 1, kind: input, shape index: {}]   ;;  %s582_s2 = inlined_call_operand.vmem [shape: f32[1,128], index: 2, kind: input, shape index: {}]   ;;  %s583_s3 = inlined_call_operand.hbm [shape: f32[32,128], index: 3, kind: output, shape index: {}]  }
   0x1   :  { %10 = vsyncpa [#allocation3 + $0x1], 0  ;;  %s481_s12 = smov 0   ;;  %s483_s13 = smov 0  }
   0x2   :  { %s485_s14 = smov 0   ;;  %s487_s15 = smov 0  }
   0x3 LB: > { %s502_s16 = sadd.s32 4294967295, %s457_s15   ;;  %s314_s17 = sadd.s32 4294967294, %s457_s15   ;;  %s457_s15 = sphi %s487_s15, %s589_s15   ;;  %s453_s14 = sphi %s485_s14, %s588_s14   ;;  %s449_s13 = sphi %s483_s13, %s587_s13   ;;  %s445_s12 = sphi %s481_s12, %s586_s12  }
   0x4   : > { %s506_s18 = sadd.s32 1, %s457_s15   ;;  %s91_s19 = sadd.s32 1, %s453_s14 }
   0x5   : > { %s88_s20 = ssub.s32 %s457_s15, %s506_s18  ;;  %p101_p0 = scmp.ne.s32.totalorder %s453_s14, %s449_s13 }
   0x6   : > { %p89_p1 = scmp.eq.s32.totalorder %s88_s20, 0  ;;  %p102_p2 = scmp.eq.s32.totalorder %s502_s16, 1 }
   0x7   : > { %p107_p3 = scmp.ne.s32.totalorder %s449_s13, %s445_s12  ;;  %p108_p4 = scmp.eq.s32.totalorder %s314_s17, 1 }
   0x8   : > { %s517_s21 = scalar_select %p89_p1, %s453_s14, %s91_s19  }
   0x9   : > { %p519_p5 = por %p102_p2, %p101_p0  ;;  %p523_p6 = por %p108_p4, %p107_p3 }
   0xa   : > { %p317_p7 = scmp.ge.s32.totalorder %s457_s15, 1  ;;  %p141_p8 = scmp.lt.s32.totalorder %s457_s15, 3 }
   0xc   : > { %p142_p9 = pnand %p317_p7, %p141_p8 }
   0xd   : > { %s319_s26 = sshll.u32 (!%p142_p9), %s502_s16, 1  ;;  %s162_s10 = sand.u32 (!%p142_p9), 1, %s449_s13  }
   0xe   : > { %145 = sbr.rel (%p142_p9) target bundleno = 175 (0xaf), region = 32  ;;  %p166_p10 = scmp.lt.s32.totalorder (!%p142_p9), %s319_s26, 3 }
   0xf   : > { %s318_s11 = sshll.u32 (!%p142_p9), %s162_s10, 4  ;;  %s352_s20 = sshll.u32 (!%p142_p9), %s502_s16, 4 }
  0x10   : > { %s164_s27 = scalar_lea.vmem (!%p142_p9), [#allocation2], %s318_s11  ;;  %s237_s30 = scalar_lea.sflag (!%p142_p9), [#allocation3], %s162_s10 }
  0x11   : > { %s249_s28 = sshll.u32 (!%p142_p9), %s164_s27, 4  ;;  %s415_s7 = scalar_lea.hbm (!%p142_p9), %s583_s3, 32  ;;  %s250_s28 = int_to_ptr.vmem [resolvable:$true] %s249_s28 }
  0x13   : > { %v351_v0 = vld [vmem:[%s581_s1 + $0x18] sm:$0xff]  ;;  %v350_v1 = vld [vmem:[%s581_s1 + $0x10] sm:$0xff]  ;;  %s591_s26 = smov (!%p166_p10, %s319_s26), 3  ;;  %v349_v2 = vld [vmem:[%s581_s1 + $0x8] sm:$0xff]  ;;  %vm216_vm0 = vcmask 523264  }
  0x14   : > { %224 = vmatpush.bf16.msra.mxu0 %v351_v0  ;;  %s320_s4 = sshll.u32 %s591_s26, 2  ;;  %v348_v3 = vld [vmem:[%s581_s1] sm:$0xff]  ;;  %s248_s26 = scalar_lea.hbm %s583_s3, %s352_s20 }
  0x15   : > { %s169_s9 = scalar_lea.vmem %s580_s0, %s320_s4  ;;  %v394_v5 = vld [vmem:[%s582_s2] ss:$0 sm:$0xff]  ;;  %s251_s29 = sshll.u32 %s248_s26, 4  ;;  %s252_s29 = int_to_ptr.hbm [resolvable:$true] %s251_s29 }
  0x16   : > { %v347_v4 = vld [vmem:[%s169_s9] sm:$0xff]  ;;  %s409_s4 = sshra.s32 %s252_s29, 4  ;;  %s410_s4 = int_to_ptr.hbm [resolvable:$true] %s409_s4 }
  0x17   : > { %s411_s16 = scalar_lea.hbm %s410_s4, 16  ;;  %p416_p0 = scmp.lt.s32.totalorder %s410_s4, %s583_s3 }
  0x18   : > { %225 = vmatpush.bf16.msra.mxu0 %v350_v1  ;;  %p412_p11 = scmp.ne.s32.totalorder %s410_s4, %s411_s16  ;;  %p417_p1 = scmp.lt.s32.totalorder %s415_s7, %s411_s16 }
  0x1a   : > { %p413_p12 = pnand %p412_p11, %p519_p5  ;;  %p418_p2 = por %p417_p1, %p416_p0 }
  0x1c   : > { %226 = vmatpush.bf16.msra.mxu0 %v349_v2  ;;  %p414_p13 = pneg %p413_p12 }
  0x1e   : > { %p419_p3 = pnand %p418_p2, %p414_p13 }
  0x20   : > { %227 = vmatpush.bf16.msra.mxu0 %v348_v3 }
  0x23   : > { %341 = vmatmul.msk.bf16.vlgmr.msra.gmra.mxu0 %vm216_vm0, %v347_v4 }
  0xa0   : > { %v229_v6 = vpop.f32.mrf.mxu0 }
  0xa1   : > { %v230_v7 = vadd.f32 %v394_v5, %v229_v6 }
  0xa3   : > { %234 = vst [vmem:[%s164_s27] sm:$0xff] %v230_v7 }
  0xa8   : > { %v231_v8 = vpop.f32.mrf.mxu0 }
  0xa9   : > { %v232_v9 = vadd.f32 %v394_v5, %v231_v8 }
  0xab   : > { %235 = vst [vmem:[%s164_s27 + $0x8] sm:$0xff] %v232_v9 }
  0xac   : > { %422 = shalt.err (!%p419_p3)
}
  0xad   : > { %s459_s10 = smov 128   ;;  %s460_s11 = smov 8  }
  0xae   : > { %353 = dma.vmem_to_hbm [thread:$0]  (%p519_p5), %s250_s28, 256, %s252_s29, %s237_s30, %s459_s10, %s459_s10, %s460_s11  }
  0xaf PF: > { %p359_p4 = scmp.ge.s32.totalorder %s457_s15, 2  ;;  %s266_s17 = sand.u32 1, %s445_s12  }
  0xb0   : > { %s267_s19 = scalar_lea.sflag [#allocation3], %s266_s17 }
  0xb1   : > { %p356_p7 = pnand %p359_p4, %p523_p6 }
  0xb3   : > { %p357_p8 = pneg %p356_p7 }
  0xb5   : > { %440 = dma.done.wait (%p357_p8), %s267_s19, 256  }
  0xb6   : > { %442 = vsyncadd (%p357_p8), %s267_s19, 4294967040  ;;  %p13_p9 = scmp.ge.s32.totalorder %s506_s18, 4   ;;  %s586_s12 = smov %s449_s13 }
  0xb7   : > { %s587_s13 = smov %s453_s14  ;;  %s588_s14 = smov %s517_s21 }
  0xb8   : > { %s589_s15 = smov %s506_s18  ;;  %15 = sbr.rel (!%p13_p9) target bundleno = 3 (0x3), region = 67 }
  0xbd   :  { %273 = vsyncpa [#allocation3], 1 }
  0xbe   :  { %275 = vsyncpa [#allocation3 + $0x1], 1 }

</bundles_post_ra>
